<compile_context>
chip_gen: v7x
topology: tpu7x:2x2x1
jax: 0.10.0
libtpu: 0.0.40
codegen_flags: <defaults>
</compile_context>

<pallas_src>
import functools

import jax
import jax.numpy as jnp
from jax.experimental import pallas as pl
from jax.experimental.pallas import tpu as pltpu


def _round_up(x, m):
    return ((x + m - 1) // m) * m


def _choose_tile_m(hw, n_classes, itemsize):
    """Lane-tile size: multiple of 128, ~2 MiB of score data per pipeline buffer."""
    target_bytes = 2 * 1024 * 1024
    tm = target_bytes // max(1, n_classes * itemsize)
    tm = max(128, (tm // 128) * 128)
    tm = min(tm, _round_up(hw, 128), 128 * 1024)
    return tm


def _dice_partial_kernel(score_ref, tgt_ref, inter_ref, ysum_ref, zsum_ref, *,
                         n_classes, hw, tile_m, apply_softmax):
    # score_ref: (1, C, TM)  predictions for one batch element (input dtype)
    # tgt_ref:   (1, 1, TM)  int32 class indices
    # inter/ysum/zsum_ref: (1, C, 1) f32 per-class partial sums, resident across
    #                      the spatial-tile grid axis (same block index for all m).
    m = pl.program_id(1)

    @pl.when(m == 0)
    def _init():
        inter_ref[...] = jnp.zeros_like(inter_ref)
        ysum_ref[...] = jnp.zeros_like(ysum_ref)
        zsum_ref[...] = jnp.zeros_like(zsum_ref)

    score = score_ref[0].astype(jnp.float32)                      # (C, TM)
    tgt = tgt_ref[0]                                              # (1, TM) int32

    partial_tile = (hw % tile_m) != 0
    valid = None
    if partial_tile:
        # Mask out-of-range lanes of the (single) partial last tile.
        col = jax.lax.broadcasted_iota(jnp.int32, (n_classes, tile_m), 1)
        valid = (col + m * tile_m) < hw
        score = jnp.where(valid, score, 0.0)

    if apply_softmax:
        # Stable softmax over the class (sublane) axis, fused into the kernel
        # so the softmax'd tensor never round-trips through HBM.
        score = score - jnp.max(score, axis=0, keepdims=True)
        e = jnp.exp(score)
        score = e / jnp.sum(e, axis=0, keepdims=True)
        if partial_tile:
            # Masked (all-zero) columns softmax to 1/C; zero them again.
            score = jnp.where(valid, score, 0.0)

    # One broadcasted compare builds the one-hot for every class at once.
    class_ids = jax.lax.broadcasted_iota(jnp.int32, (n_classes, tile_m), 0)
    one_hot = tgt == class_ids                                    # (C, TM) bool
    if partial_tile:
        one_hot = jnp.logical_and(one_hot, valid)

    one_hot_f = one_hot.astype(jnp.float32)

    # Three lane-axis reductions per tile, accumulated into the resident blocks.
    inter_ref[0] += jnp.sum(jnp.where(one_hot, score, 0.0), axis=-1, keepdims=True)
    # one_hot is 0/1, so sum(one_hot**2) == sum(one_hot): skip the extra multiply.
    ysum_ref[0] += jnp.sum(one_hot_f, axis=-1, keepdims=True)
    zsum_ref[0] += jnp.sum(score * score, axis=-1, keepdims=True)


def dice_loss(inputs, target, n_classes, weight=None, softmax=False):
    """Pallas implementation of DiceLoss.forward.

    inputs: (N, C, H, W) float scores/logits.
    target: (N, H, W) integer class map (values in [0, n_classes)).
    """
    if weight is None:
        weight = [1.0] * n_classes
    weight = jnp.asarray(weight, dtype=jnp.float32).reshape(n_classes)

    N, C, H, W = inputs.shape
    assert C == n_classes, (C, n_classes)
    assert target.shape == (N, H, W), (target.shape, inputs.shape)
    HW = H * W

    # Free reshapes only: no transpose, no float cast of the full target tensor.
    score = inputs.reshape(N, C, HW)
    tgt = target.reshape(N, 1, HW).astype(jnp.int32)

    tile_m = _choose_tile_m(HW, C, jnp.dtype(score.dtype).itemsize)
    mt = pl.cdiv(HW, tile_m)

    kernel = functools.partial(
        _dice_partial_kernel, n_classes=C, hw=HW, tile_m=tile_m,
        apply_softmax=bool(softmax))

    out_sd = jax.ShapeDtypeStruct((N, C, 1), jnp.float32)
    acc_spec = pl.BlockSpec((1, C, 1), lambda n, m: (n, 0, 0))

    intersect, y_sum, z_sum = pl.pallas_call(
        kernel,
        grid=(N, mt),
        in_specs=[
            pl.BlockSpec((1, C, tile_m), lambda n, m: (n, 0, m)),
            pl.BlockSpec((1, 1, tile_m), lambda n, m: (n, 0, m)),
        ],
        out_specs=(acc_spec, acc_spec, acc_spec),
        out_shape=(out_sd, out_sd, out_sd),
        compiler_params=pltpu.CompilerParams(
            dimension_semantics=("parallel", "arbitrary")),
    )(score, tgt)

    # Tiny finalize (a few C-length vectors) stays in plain JAX.
    intersect = jnp.sum(intersect[:, :, 0], axis=0)   # (C,)
    y_sum = jnp.sum(y_sum[:, :, 0], axis=0)           # (C,)
    z_sum = jnp.sum(z_sum[:, :, 0], axis=0)           # (C,)
    smooth = jnp.float32(1e-05)
    dice = 1.0 - (2.0 * intersect + smooth) / (z_sum + y_sum + smooth)
    return jnp.sum(dice * weight) / jnp.float32(n_classes)


def _dice_loss_reference(inputs, target, n_classes, weight=None, softmax=False):
    """Pure-JAX reference mirroring the PyTorch module semantics."""
    if softmax:
        inputs = jax.nn.softmax(inputs, axis=1)
    if weight is None:
        weight = [1.0] * n_classes
    one_hot = jnp.stack(
        [(target == i).astype(jnp.float32) for i in range(n_classes)], axis=1
    )
    smooth = 1e-05
    loss = 0.0
    for i in range(n_classes):
        s = inputs[:, i].astype(jnp.float32)
        t = one_hot[:, i]
        intersect = jnp.sum(s * t)
        y_sum = jnp.sum(t * t)
        z_sum = jnp.sum(s * s)
        dice = 1.0 - (2 * intersect + smooth) / (z_sum + y_sum + smooth)
        loss = loss + dice * weight[i]
    return loss / n_classes


if __name__ == "__main__":
    N_CLASSES = 4
    key = jax.random.PRNGKey(0)
    k1, k2 = jax.random.split(key)

    # Small shapes consistent with the module: batch=2, classes=4, spatial=16x16.
    inputs = jax.random.normal(k1, (2, N_CLASSES, 16, 16), dtype=jnp.float32)
    target = jax.random.randint(k2, (2, 16, 16), 0, N_CLASSES, dtype=jnp.int32)

    # Default forward path (softmax=False, weight=None).
    loss = jax.block_until_ready(dice_loss(inputs, target, N_CLASSES))
    ref = _dice_loss_reference(inputs, target, N_CLASSES)
    assert jnp.allclose(loss, ref, rtol=1e-5, atol=1e-6), (loss, ref)

    # softmax=True path (softmax fused inside the kernel).
    loss_sm = jax.block_until_ready(dice_loss(inputs, target, N_CLASSES, softmax=True))
    ref_sm = _dice_loss_reference(inputs, target, N_CLASSES, softmax=True)
    assert jnp.allclose(loss_sm, ref_sm, rtol=1e-5, atol=1e-5), (loss_sm, ref_sm)

    # Weighted path with H*W not a multiple of the 128-lane tile (masking path).
    k3, k4 = jax.random.split(k2)
    inputs2 = jax.random.normal(k3, (1, N_CLASSES, 10, 10), dtype=jnp.float32)
    target2 = jax.random.randint(k4, (1, 10, 10), 0, N_CLASSES, dtype=jnp.int32)
    w = [0.5, 1.0, 1.5, 2.0]
    loss_w = jax.block_until_ready(dice_loss(inputs2, target2, N_CLASSES, weight=w))
    ref_w = _dice_loss_reference(inputs2, target2, N_CLASSES, weight=w)
    assert jnp.allclose(loss_w, ref_w, rtol=1e-5, atol=1e-6), (loss_w, ref_w)

    # softmax=True + masked partial tile together.
    loss_wsm = jax.block_until_ready(
        dice_loss(inputs2, target2, N_CLASSES, weight=w, softmax=True))
    ref_wsm = _dice_loss_reference(inputs2, target2, N_CLASSES, weight=w, softmax=True)
    assert jnp.allclose(loss_wsm, ref_wsm, rtol=1e-5, atol=1e-5), (loss_wsm, ref_wsm)

    print("KERNEL_OK")
</pallas_src>

<mosaic_0001>
module attributes {stable_mosaic.version = 11 : i64} {
  func.func @_dice_partial_kernel(%arg0: i32, %arg1: i32, %arg2: memref<1x4x256xf32, #tpu.memory_space<vmem>>, %arg3: memref<1x1x256xi32, #tpu.memory_space<vmem>>, %arg4: memref<1x4x1xf32, #tpu.memory_space<vmem>>, %arg5: memref<1x4x1xf32, #tpu.memory_space<vmem>>, %arg6: memref<1x4x1xf32, #tpu.memory_space<vmem>>) attributes {dimension_semantics = [#tpu.dimension_semantics<parallel>, #tpu.dimension_semantics<arbitrary>], iteration_bounds = array<i64: 2, 1>, scalar_prefetch = 0 : i64, scratch_operands = 0 : i64, tpu.core_type = #tpu.core_type<tc>, window_params = [{transform_indices = @transform_0, window_bounds = array<i64: 1, 4, 256>}, {transform_indices = @transform_1, window_bounds = array<i64: 1, 1, 256>}, {transform_indices = @transform_2, window_bounds = array<i64: 1, 4, 1>}, {transform_indices = @transform_3, window_bounds = array<i64: 1, 4, 1>}, {transform_indices = @transform_4, window_bounds = array<i64: 1, 4, 1>}]} {
    %c0_i32 = arith.constant 0 : i32
    %0 = arith.cmpi eq, %arg1, %c0_i32 : i32
    %1 = arith.extui %0 : i1 to i32
    %c0_i32_0 = arith.constant 0 : i32
    %2 = arith.cmpi ne, %1, %c0_i32_0 : i32
    scf.if %2 {
      %cst_27 = arith.constant 0.000000e+00 : f32
      %39 = vector.broadcast %cst_27 : f32 to vector<1x4x1xf32>
      %c0_28 = arith.constant 0 : index
      %c0_29 = arith.constant 0 : index
      %c0_30 = arith.constant 0 : index
      %40 = vector.load %arg4[%c0_28, %c0_29, %c0_30] : memref<1x4x1xf32, #tpu.memory_space<vmem>>, vector<1x4x1xf32>
      tpu.vector_store %arg4[%c0_28, %c0_29, %c0_30], %39 {strides = array<i32>} : memref<1x4x1xf32, #tpu.memory_space<vmem>>, vector<1x4x1xf32>,
      %cst_31 = arith.constant 0.000000e+00 : f32
      %41 = vector.broadcast %cst_31 : f32 to vector<1x4x1xf32>
      %c0_32 = arith.constant 0 : index
      %c0_33 = arith.constant 0 : index
      %c0_34 = arith.constant 0 : index
      %42 = vector.load %arg5[%c0_32, %c0_33, %c0_34] : memref<1x4x1xf32, #tpu.memory_space<vmem>>, vector<1x4x1xf32>
      tpu.vector_store %arg5[%c0_32, %c0_33, %c0_34], %41 {strides = array<i32>} : memref<1x4x1xf32, #tpu.memory_space<vmem>>, vector<1x4x1xf32>,
      %cst_35 = arith.constant 0.000000e+00 : f32
      %43 = vector.broadcast %cst_35 : f32 to vector<1x4x1xf32>
      %c0_36 = arith.constant 0 : index
      %c0_37 = arith.constant 0 : index
      %c0_38 = arith.constant 0 : index
      %44 = vector.load %arg6[%c0_36, %c0_37, %c0_38] : memref<1x4x1xf32, #tpu.memory_space<vmem>>, vector<1x4x1xf32>
      tpu.vector_store %arg6[%c0_36, %c0_37, %c0_38], %43 {strides = array<i32>} : memref<1x4x1xf32, #tpu.memory_space<vmem>>, vector<1x4x1xf32>,
    } else {
    }
    %c0 = arith.constant 0 : index
    %c0_1 = arith.constant 0 : index
    %c0_2 = arith.constant 0 : index
    %3 = vector.load %arg2[%c0, %c0_1, %c0_2] : memref<1x4x256xf32, #tpu.memory_space<vmem>>, vector<1x4x256xf32>
    %4 = vector.shape_cast %3 : vector<1x4x256xf32> to vector<4x256xf32>
    %c0_3 = arith.constant 0 : index
    %c0_4 = arith.constant 0 : index
    %c0_5 = arith.constant 0 : index
    %5 = vector.load %arg3[%c0_3, %c0_4, %c0_5] : memref<1x1x256xi32, #tpu.memory_space<vmem>>, vector<1x1x256xi32>
    %6 = vector.shape_cast %5 : vector<1x1x256xi32> to vector<1x256xi32>
    %7 = tpu.iota {dimensions = array<i32: 0>} : vector<4x256xi32>
    %8 = vector.broadcast %6 : vector<1x256xi32> to vector<4x256xi32>
    %9 = arith.cmpi eq, %8, %7 : vector<4x256xi32>
    %10 = arith.extui %9 : vector<4x256xi1> to vector<4x256xi32>
    %11 = arith.sitofp %10 : vector<4x256xi32> to vector<4x256xf32>
    %c0_6 = arith.constant 0 : index
    %c0_7 = arith.constant 0 : index
    %c0_8 = arith.constant 0 : index
    %12 = vector.load %arg4[%c0_6, %c0_7, %c0_8] : memref<1x4x1xf32, #tpu.memory_space<vmem>>, vector<1x4x1xf32>
    %13 = vector.shape_cast %12 : vector<1x4x1xf32> to vector<4x1xf32>
    %cst = arith.constant 0.000000e+00 : f32
    %14 = vector.broadcast %cst : f32 to vector<4x256xf32>
    %15 = arith.select %9, %4, %14 : vector<4x256xi1>, vector<4x256xf32>
    %cst_9 = arith.constant dense<0.000000e+00> : vector<4xf32>
    %16 = vector.multi_reduction <add>, %15, %cst_9 [1] : vector<4x256xf32> to vector<4xf32>
    %17 = vector.shape_cast %16 : vector<4xf32> to vector<4x1xf32>
    %18 = arith.addf %13, %17 : vector<4x1xf32>
    %c0_10 = arith.constant 0 : index
    %c0_11 = arith.constant 0 : index
    %c0_12 = arith.constant 0 : index
    %19 = vector.load %arg4[%c0_10, %c0_11, %c0_12] : memref<1x4x1xf32, #tpu.memory_space<vmem>>, vector<1x4x1xf32>
    %20 = vector.shape_cast %19 : vector<1x4x1xf32> to vector<4x1xf32>
    %21 = vector.shape_cast %18 : vector<4x1xf32> to vector<1x4x1xf32>
    tpu.vector_store %arg4[%c0_10, %c0_11, %c0_12], %21 {strides = array<i32>} : memref<1x4x1xf32, #tpu.memory_space<vmem>>, vector<1x4x1xf32>,
    %c0_13 = arith.constant 0 : index
    %c0_14 = arith.constant 0 : index
    %c0_15 = arith.constant 0 : index
    %22 = vector.load %arg5[%c0_13, %c0_14, %c0_15] : memref<1x4x1xf32, #tpu.memory_space<vmem>>, vector<1x4x1xf32>
    %23 = vector.shape_cast %22 : vector<1x4x1xf32> to vector<4x1xf32>
    %cst_16 = arith.constant dense<0.000000e+00> : vector<4xf32>
    %24 = vector.multi_reduction <add>, %11, %cst_16 [1] : vector<4x256xf32> to vector<4xf32>
    %25 = vector.shape_cast %24 : vector<4xf32> to vector<4x1xf32>
    %26 = arith.addf %23, %25 : vector<4x1xf32>
    %c0_17 = arith.constant 0 : index
    %c0_18 = arith.constant 0 : index
    %c0_19 = arith.constant 0 : index
    %27 = vector.load %arg5[%c0_17, %c0_18, %c0_19] : memref<1x4x1xf32, #tpu.memory_space<vmem>>, vector<1x4x1xf32>
    %28 = vector.shape_cast %27 : vector<1x4x1xf32> to vector<4x1xf32>
    %29 = vector.shape_cast %26 : vector<4x1xf32> to vector<1x4x1xf32>
    tpu.vector_store %arg5[%c0_17, %c0_18, %c0_19], %29 {strides = array<i32>} : memref<1x4x1xf32, #tpu.memory_space<vmem>>, vector<1x4x1xf32>,
    %c0_20 = arith.constant 0 : index
    %c0_21 = arith.constant 0 : index
    %c0_22 = arith.constant 0 : index
    %30 = vector.load %arg6[%c0_20, %c0_21, %c0_22] : memref<1x4x1xf32, #tpu.memory_space<vmem>>, vector<1x4x1xf32>
    %31 = vector.shape_cast %30 : vector<1x4x1xf32> to vector<4x1xf32>
    %32 = arith.mulf %4, %4 : vector<4x256xf32>
    %cst_23 = arith.constant dense<0.000000e+00> : vector<4xf32>
    %33 = vector.multi_reduction <add>, %32, %cst_23 [1] : vector<4x256xf32> to vector<4xf32>
    %34 = vector.shape_cast %33 : vector<4xf32> to vector<4x1xf32>
    %35 = arith.addf %31, %34 : vector<4x1xf32>
    %c0_24 = arith.constant 0 : index
    %c0_25 = arith.constant 0 : index
    %c0_26 = arith.constant 0 : index
    %36 = vector.load %arg6[%c0_24, %c0_25, %c0_26] : memref<1x4x1xf32, #tpu.memory_space<vmem>>, vector<1x4x1xf32>
    %37 = vector.shape_cast %36 : vector<1x4x1xf32> to vector<4x1xf32>
    %38 = vector.shape_cast %35 : vector<4x1xf32> to vector<1x4x1xf32>
    tpu.vector_store %arg6[%c0_24, %c0_25, %c0_26], %38 {strides = array<i32>} : memref<1x4x1xf32, #tpu.memory_space<vmem>>, vector<1x4x1xf32>,
    return
  }
  func.func @transform_0(%arg0: i32, %arg1: i32) -> (i32, i32, i32) {
    %c0_i32 = arith.constant 0 : i32
    %c0_i32_0 = arith.constant 0 : i32
    return %arg0, %c0_i32, %arg1 : i32, i32, i32
  }
  func.func @transform_1(%arg0: i32, %arg1: i32) -> (i32, i32, i32) {
    %c0_i32 = arith.constant 0 : i32
    %c0_i32_0 = arith.constant 0 : i32
    return %arg0, %c0_i32, %arg1 : i32, i32, i32
  }
  func.func @transform_2(%arg0: i32, %arg1: i32) -> (i32, i32, i32) {
    %c0_i32 = arith.constant 0 : i32
    %c0_i32_0 = arith.constant 0 : i32
    %c0_i32_1 = arith.constant 0 : i32
    return %arg0, %c0_i32, %c0_i32_0 : i32, i32, i32
  }
  func.func @transform_3(%arg0: i32, %arg1: i32) -> (i32, i32, i32) {
    %c0_i32 = arith.constant 0 : i32
    %c0_i32_0 = arith.constant 0 : i32
    %c0_i32_1 = arith.constant 0 : i32
    return %arg0, %c0_i32, %c0_i32_0 : i32, i32, i32
  }
  func.func @transform_4(%arg0: i32, %arg1: i32) -> (i32, i32, i32) {
    %c0_i32 = arith.constant 0 : i32
    %c0_i32_0 = arith.constant 0 : i32
    %c0_i32_1 = arith.constant 0 : i32
    return %arg0, %c0_i32, %c0_i32_0 : i32, i32, i32
  }
}

</mosaic_0001>

<bundles_post_ra>
// kernel: tpu_custom_call.1
= control target key start
LH: loop header
LB: loop body
LE: loop exit
PB: predicated region body
PF: predicated region fallthrough
CT: control target
= control target key end

     0   :  { %10 = vsyncpa [#allocation3], 0  ;;  %s936_s0 = inlined_call_operand.hbm [shape: f32[2,4,256], index: 0, kind: input, shape index: {}]   ;;  %s937_s1 = inlined_call_operand.hbm [shape: s32[2,1,256], index: 1, kind: input, shape index: {}]   ;;  %s938_s2 = inlined_call_operand.vmem [shape: f32[2,4,1], index: 2, kind: output, shape index: {0}]   ;;  %s939_s3 = inlined_call_operand.vmem [shape: f32[2,4,1], index: 3, kind: output, shape index: {1}]   ;;  %s940_s4 = inlined_call_operand.vmem [shape: f32[2,4,1], index: 4, kind: output, shape index: {2}]  }
   0x1   :  { %12 = vsyncpa [#allocation3 + $0x1], 0 }
   0x2   :  { %13 = vsyncpa [#allocation5], 0 }
   0x3   :  { %15 = vsyncpa [#allocation5 + $0x1], 0  ;;  %s748_s15 = smov 0   ;;  %s750_s16 = smov 0  }
   0x4   :  { %s752_s17 = smov 0   ;;  %s754_s18 = smov 0  }
   0x5   :  { %s756_s19 = smov 0   ;;  %s758_s20 = smov 0  }
   0x6 LB: > { %s520_s21 = sadd.s32 4294967295, %s718_s20   ;;  %s33_s22 = sadd.s32 1, %s714_s19  ;;  %s718_s20 = sphi %s758_s20, %s21_s20   ;;  %s714_s19 = sphi %s756_s19, %s954_s19   ;;  %s710_s18 = sphi %s754_s18, %s953_s18   ;;  %s706_s17 = sphi %s752_s17, %s952_s17   ;;  %s702_s16 = sphi %s750_s16, %s951_s16   ;;  %s698_s15 = sphi %s748_s15, %s950_s15  }
   0x7   : > { %p35_p0 = scmp.ge.s32.totalorder %s33_s22, 2  ;;  %s42_s23 = sadd.s32 1, %s706_s17 }
   0x8   : > { %p49_p1 = scmp.ne.s32.totalorder %s706_s17, %s702_s16  ;;  %p50_p2 = scmp.eq.s32.totalorder %s718_s20, 0 }
   0x9   : > { %s956_s22 = smov (%p35_p0, %s33_s22), 0  ;;  %p55_p4 = scmp.ne.s32.totalorder %s702_s16, %s698_s15 }
   0xa   : > { %p784_p3 = por %p50_p2, %p49_p1  ;;  %s37_s25 = ssub.s32 %s714_s19, %s956_s22 }
   0xb   : > { %p56_p5 = scmp.eq.s32.totalorder %s520_s21, 0  ;;  %p40_p6 = scmp.eq.s32.totalorder %s37_s25, 0 }
   0xc   : > { %p553_p8 = scmp.lt.s32.totalorder %s718_s20, 2  ;;  %s800_s28 = sand.u32 1, %s706_s17  }
   0xd   : > { %p791_p7 = por %p56_p5, %p55_p4  ;;  %s540_s29 = sshll.u32 %s714_s19, 7 }
   0xe   : > { %s797_s27 = scalar_select %p40_p6, %s706_s17, %s42_s23  }
   0xf   : > { %s943_s26 = scalar_select %p791_p7, 1, 0 }
  0x10   : > { %s524_s30 = sshll.u32 %s800_s28, 3  ;;  %s807_s7 = scalar_lea.hbm %s936_s0, %s540_s29 }
  0x11   : > { %s189_s8 = scalar_lea.vmem [#allocation2], %s524_s30  ;;  %p811_p9 = pnand %p553_p8, %p784_p3 }
  0x12   : > { %s199_s9 = sshll.u32 %s189_s8, 4  ;;  %s186_s11 = scalar_lea.sflag [#allocation3], %s800_s28  ;;  %s815_s9 = int_to_ptr.vmem [resolvable:$true] %s199_s9 }
  0x13   : > { %s604_s12 = scalar_lea.hbm %s807_s7, 128  ;;  %p606_p13 = pneg %p811_p9 }
  0x14   : > { %p605_p12 = scmp.ne.s32.totalorder %s807_s7, %s604_s12  ;;  %s609_s15 = scalar_lea.hbm %s936_s0, 256 }
  0x15   : > { %p610_p2 = scmp.lt.u32.totalorder %s807_s7, %s936_s0  ;;  %p611_p3 = scmp.lt.u32.totalorder %s609_s15, %s604_s12 }
  0x16   : > { %p607_p0 = pnand %p606_p13, %p605_p12  ;;  %p613_p5 = scmp.lt.u32.totalorder %s604_s12, %s807_s7 }
  0x17   : > { %p612_p4 = por %p611_p3, %p610_p2 }
  0x18   : > { %p608_p1 = pneg %p607_p0 }
  0x19   : > { %p614_p6 = por %p613_p5, %p612_p4 }
  0x1b   : > { %p615_p8 = pnand %p614_p6, %p608_p1 }
  0x1d   : > { %618 = shalt.err (!%p615_p8)
}
  0x1e   : > { %s619_s24 = scalar_lea.vmem %s815_s9, 128  ;;  %s720_s25 = smov [#allocation2]  }
  0x1f   : > { %p620_p12 = scmp.ne.s32.totalorder %s815_s9, %s619_s24  ;;  %s624_s29 = sshll.u32 %s720_s25, 4  ;;  %s625_s29 = int_to_ptr.vmem [resolvable:$false] %s624_s29 }
  0x20   : > { %s626_s30 = scalar_lea.vmem %s625_s29, 256  ;;  %p627_p11 = scmp.lt.s32.totalorder %s815_s9, %s625_s29 }
  0x21   : > { %p622_p0 = pnand %p620_p12, %p606_p13  ;;  %p628_p2 = scmp.lt.s32.totalorder %s626_s30, %s619_s24 }
  0x23   : > { %p623_p10 = pneg %p622_p0  ;;  %p629_p3 = por %p628_p2, %p627_p11 }
  0x25   : > { %p630_p4 = pnand %p629_p3, %p623_p10 }
  0x27   : > { %633 = shalt.err (!%p630_p4)
}
  0x28   : > { %549 = dma.hbm_to_vmem [thread:$0]  (!%p811_p9), %s807_s7, 128, %s815_s9, %s186_s11  }
  0x29   : > { %p945_p1 = scmp.lt.s32.totalorder %s718_s20, 3  ;;  %p946_p5 = scmp.ge.s32.totalorder %s718_s20, 1 }
  0x2a   : > { %s527_s6 = sshll.u32 %s800_s28, 1  ;;  %s541_s8 = sshll.u32 %s714_s19, 5 }
  0x2b   : > { %p849_p6 = pnand %p946_p5, %p945_p1  ;;  %s858_s14 = scalar_lea.hbm %s937_s1, %s541_s8 }
  0x2c   : > { %s210_s15 = scalar_lea.vmem [#allocation4], %s527_s6  ;;  %s207_s7 = scalar_lea.sflag [#allocation5], %s800_s28 }
  0x2d   : > { %s947_s5 = scalar_select %p849_p6, 1, 0 }
  0x2e   : > { %s220_s21 = sshll.u32 %s210_s15, 4  ;;  %s634_s9 = scalar_lea.hbm %s858_s14, 32  ;;  %s221_s21 = int_to_ptr.vmem [resolvable:$true] %s220_s21 }
  0x2f   : > { %p635_p10 = scmp.ne.s32.totalorder %s858_s14, %s634_s9  ;;  %s639_s24 = scalar_lea.hbm %s937_s1, 64 }
  0x30   : > { %p640_p12 = scmp.lt.u32.totalorder %s858_s14, %s937_s1  ;;  %p641_p0 = scmp.lt.u32.totalorder %s639_s24, %s634_s9 }
  0x31   : > { %p637_p11 = pnand %p635_p10, %p606_p13  ;;  %p643_p3 = scmp.lt.u32.totalorder %s634_s9, %s858_s14 }
  0x32   : > { %p642_p2 = por %p641_p0, %p640_p12 }
  0x33   : > { %p638_p8 = pneg %p637_p11 }
  0x34   : > { %p644_p4 = por %p643_p3, %p642_p2 }
  0x36   : > { %p645_p1 = pnand %p644_p4, %p638_p8 }
  0x38   : > { %648 = shalt.err (!%p645_p1)
}
  0x39   : > { %s649_s28 = scalar_lea.vmem %s221_s21, 32  ;;  %s721_s30 = smov [#allocation4]  }
  0x3a   : > { %p650_p5 = scmp.ne.s32.totalorder %s221_s21, %s649_s28  ;;  %s654_s6 = sshll.u32 %s721_s30, 4  ;;  %s655_s6 = int_to_ptr.vmem [resolvable:$false] %s654_s6 }
  0x3b   : > { %s656_s8 = scalar_lea.vmem %s655_s6, 64  ;;  %p657_p7 = scmp.lt.s32.totalorder %s221_s21, %s655_s6 }
  0x3c   : > { %p652_p10 = pnand %p650_p5, %p606_p13  ;;  %p658_p6 = scmp.lt.s32.totalorder %s656_s8, %s649_s28 }
  0x3e   : > { %p653_p11 = pneg %p652_p10  ;;  %p659_p0 = por %p658_p6, %p657_p7 }
  0x40   : > { %p660_p12 = pnand %p659_p0, %p653_p11 }
  0x42   : > { %663 = shalt.err (!%p660_p12)
}
  0x43   : > { %552 = dma.hbm_to_vmem [thread:$0]  (!%p811_p9), %s858_s14, 32, %s221_s21, %s207_s7  }
  0x44   : > { %p948_p8 = scmp.ne.s32.totalorder %s947_s5, 0 }
  0x45   : > { %s231_s12 = sand.u32 (!%p948_p8), 1, %s702_s16   ;;  %p949_p13 = scmp.ne.s32.totalorder (!%p948_p8), %s943_s26, 0 }
  0x46   : > { %229 = sbr.rel (%p948_p8) target bundleno = 243 (0xf3), region = 28  ;;  %s531_s13 = sshll.u32 (!%p948_p8), %s231_s12, 3 }
  0x47   : > { %s232_s15 = scalar_lea.sflag (!%p948_p8), [#allocation3], %s231_s12  ;;  %s235_s9 = scalar_lea.vmem (!%p948_p8), [#allocation2], %s531_s13 }
  0x4d   : > { %689 = dma.done.wait (%p949_p13), %s232_s15, 128  }
  0x4e   : > { %691 = vsyncadd (%p949_p13), %s232_s15, 4294967168  ;;  %s532_s11 = sshll.u32 %s231_s12, 1  ;;  %s241_s23 = scalar_lea.sflag [#allocation5], %s231_s12 }
  0x4f   : > { %s244_s10 = scalar_lea.vmem [#allocation4], %s532_s11 }
  0x50   : > { %693 = dma.done.wait (%p949_p13), %s241_s23, 32  }
  0x51   : > { %695 = vsyncadd (%p949_p13), %s241_s23, 4294967264  ;;  %v305_v0 = vlaneseq  ;;  %p283_p7 = scmp.lt.s32.totalorder %s710_s18, 1  ;;  %vm299_vm0 = vcmask 3072   ;;  %v722_v4 = vmov 0.0   ;;  %v303_v5 = vld [vmem:[%s235_s9] sm:$0xff]  ;;  %vm327_vm1 = vcmask 1043456  }
  0x52   : > { %v304_v6 = vld [vmem:[%s244_s10] sm:$0x3]  ;;  %v323_v9 = vcombine.high %v303_v5, %v303_v5  ;;  %v345_v10 = vmul.f32 %v303_v5, %v303_v5 }
  0x53   : > { %v306_v1 = vshrl.u32 %v305_v0, 7  ;;  %s958_s18 = smov (!%p283_p7, %s710_s18), 1 }
  0x54   : > { %s893_s5 = sshll.u32 %s958_s18, 2  ;;  %v347_v11 = vcombine.high %v345_v10, %v345_v10  ;;  %v349_v12 = vsel %vm327_vm1, %v345_v10, 0.0 }
  0x55   : > { %v309_v2 = vsub.s32 0, %v306_v1  ;;  %v313_v3 = vsub.s32 1, %v306_v1  ;;  %s899_s7 = scalar_lea.vmem %s938_s2, %s893_s5  ;;  %s294_s24 = scalar_lea.vmem %s940_s4, %s893_s5 }
  0x56   : > { %300 = vst.msk [vmem:[%s899_s7] sm:$0xf] %vm299_vm0, %v722_v4  ;;  %v350_v19 = vsel %vm327_vm1, %v347_v11, 0.0  ;;  %s290_s28 = scalar_lea.vmem %s939_s3, %s893_s5  ;;  %302 = vst.msk [vmem:[%s294_s24] sm:$0xf] %vm299_vm0, %v722_v4 }
  0x57   : > { %v310_v7 = vrot.slane %v304_v6, %v309_v2  ;;  %v314_v8 = vrot.slane %v304_v6, %v313_v3  ;;  %v351_v22 = vadd.f32 %v350_v19, %v349_v12  ;;  %301 = vst.msk [vmem:[%s290_s28] sm:$0xf] %vm299_vm0, %v722_v4 }
  0x59   : > { %vm315_vm2 = vcmp.eq.s32.totalorder %v310_v7, %v306_v1  ;;  %vm316_vm3 = vcmp.eq.s32.totalorder %v314_v8, %v306_v1  ;;  %352 = vadd.xlane.f32.xlu1 %v351_v22 }
  0x5a   : > { %v325_v13 = vsel %vm315_vm2, %v303_v5, 0.0  ;;  %v326_v14 = vsel %vm316_vm3, %v323_v9, 0.0  ;;  %v536_v15 = vsel %vm315_vm2, 1.0, %v722_v4  ;;  %v537_v16 = vsel %vm316_vm3, 1.0, %v722_v4 }
  0x5b   : > { %v328_v17 = vsel %vm327_vm1, %v325_v13, 0.0  ;;  %v329_v18 = vsel %vm327_vm1, %v326_v14, 0.0  ;;  %v337_v20 = vsel %vm327_vm1, %v536_v15, 0.0  ;;  %v338_v23 = vsel %vm327_vm1, %v537_v16, 0.0 }
  0x5c   : > { %v330_v21 = vadd.f32 %v329_v18, %v328_v17  ;;  %v339_v24 = vadd.f32 %v338_v23, %v337_v20 }
  0x5d   : > { %v321_v25 = vld [vmem:[%s899_s7] sm:$0xf] }
  0x5e   : > { %331 = vadd.xlane.f32.xlu0 %v330_v21  ;;  %v344_v26 = vld [vmem:[%s294_s24] sm:$0xf] }
  0x5f   : > { %v336_v31 = vld [vmem:[%s290_s28] sm:$0xf] }
  0x62   : > { %340 = vadd.xlane.f32.xlu0 %v339_v24 }
  0xe6   : > { %v353_v28 = vpop.xlane.xlu1 %352 }
  0xe7   : > { %v354_v30 = vadd.f32 %v353_v28, %v344_v26 }
  0xe9   : > { %355 = vst.msk [vmem:[%s294_s24] sm:$0xf] %vm299_vm0, %v354_v30 }
  0xeb   : > { %v332_v27 = vpop.xlane.xlu0 %331 }
  0xec   : > { %v333_v29 = vadd.f32 %v332_v27, %v321_v25 }
  0xee   : > { %335 = vst.msk [vmem:[%s899_s7] sm:$0xf] %vm299_vm0, %v333_v29 }
  0xef   : > { %v341_v32 = vpop.xlane.xlu0 %340 }
  0xf0   : > { %v342_v33 = vadd.f32 %v341_v32, %v336_v31 }
  0xf2   : > { %343 = vst.msk [vmem:[%s290_s28] sm:$0xf] %vm299_vm0, %v342_v33 }
  0xf3 PF: > { %s21_s20 = sadd.s32 1, %s718_s20   ;;  %s950_s15 = smov %s702_s16 }
  0xf4   : > { %p18_p9 = scmp.ge.s32.totalorder %s21_s20, 4   ;;  %s951_s16 = smov %s706_s17 }
  0xf5   : > { %s952_s17 = smov %s797_s27  ;;  %s953_s18 = smov %s714_s19 }
  0xf6   : > { %s954_s19 = smov %s956_s22  ;;  %20 = sbr.rel (!%p18_p9) target bundleno = 6 (0x6), region = 109 }
  0xfd   :  { %403 = vsyncpa [#allocation3], 1 }
  0xfe   :  { %405 = vsyncpa [#allocation3 + $0x1], 1 }
  0xff   :  { %406 = vsyncpa [#allocation5], 1 }
 0x100   :  { %408 = vsyncpa [#allocation5 + $0x1], 1 }

</bundles_post_ra>
